<compile_context>
chip_gen: v5e
topology: v5e:2x2
jax: 0.10.0
libtpu: 0.0.40
codegen_flags: <defaults>
</compile_context>

<pallas_src>
import jax
import jax.numpy as jnp
from jax import lax
from jax.experimental import pallas as pl
from jax.experimental.pallas import tpu as pltpu


def _onehot_gather_kernel(ids_ref, w_ref, out_ref):
    """One grid step: gather `chunk` embedding rows via a one-hot MXU matmul.

    ids_ref: VMEM (chunk, 1) int32 token ids (pre-clamped to [0, V-1]).
    w_ref:   VMEM (Vp, D) embedding table, resident across the grid.
    out_ref: VMEM (chunk, D) float32 output tile.
    """
    chunk = ids_ref.shape[0]
    vp = w_ref.shape[0]
    ids = ids_ref[...]                                        # (chunk, 1)
    cols = lax.broadcasted_iota(jnp.int32, (chunk, vp), 1)    # (chunk, Vp)
    onehot = (ids == cols).astype(w_ref.dtype)                # exact 0/1
    out_ref[...] = jnp.dot(
        onehot, w_ref[...], preferred_element_type=jnp.float32
    ).astype(out_ref.dtype)


def _round_up(x, m):
    return ((x + m - 1) // m) * m


def _vmem_capacity_bytes():
    try:
        return int(pltpu.get_tpu_info().vmem_capacity_bytes)
    except Exception:
        return 64 << 20  # v7x per-TensorCore VMEM; the smallest of v5e/v6e/v7x


def _chunk_axis_semantics():
    # v7x has two TensorCores per chip; only CORE_PARALLEL actually shards the
    # grid across them.  Plain "parallel" is the safe choice elsewhere.
    try:
        kind = jax.devices()[0].device_kind.lower()
    except Exception:
        kind = ""
    if "v7" in kind:
        return (pltpu.CORE_PARALLEL,)
    return ("parallel",)


def _table_block_spec(vp, d, single_buffer):
    index_map = lambda i: (0, 0)  # constant block index -> fetched once
    if single_buffer:
        try:
            # Constant-index resident table: one buffer is enough, halving its
            # VMEM footprint (matters most on v7x's 64 MiB VMEM).
            return pl.BlockSpec((vp, d), index_map, pipeline_mode=pl.Buffered(1))
        except Exception:
            pass
    return pl.BlockSpec((vp, d), index_map)


def embedding_forward(rev, lab, weight, *, chunk_target=512):
    """Pallas implementation of Model.forward.

    rev:    [B, L] integer token ids
    lab:    any array, passed through untouched
    weight: [V, D] float32 embedding table
    returns (rev_embedded_flat [B, L*D] float32, lab)
    """
    B, L = rev.shape
    V, D = weight.shape
    n = B * L

    # --- sizing / padding ----------------------------------------------------
    vp = _round_up(max(V, 8), 128)          # one-hot contraction dim (MXU-friendly)
    d_lanes = _round_up(D, 128)             # lane-padded width (VMEM layout)

    vmem_cap = _vmem_capacity_bytes()
    budget = int(vmem_cap * 3 // 4)         # leave headroom for Mosaic scratch

    # Generation-aware resident-table gate: prefer f32; fall back to bf16 when
    # an f32 table would not comfortably fit the per-core VMEM budget.
    w_dtype, w_item = jnp.float32, 4
    if vp * d_lanes * w_item > budget // 2:
        w_dtype, w_item = jnp.bfloat16, 2   # one rounding of error per row
        # TODO(synk): if even the bf16 table exceeds the VMEM budget, switch to
        # a chunked manual HBM-DMA gather (memory_space=pl.ANY + async copies).
    table_bytes = vp * d_lanes * w_item

    # Rows per grid step: large enough to amortize per-step overhead, small
    # enough that the one-hot + id/output tiles fit what is left of VMEM.
    per_row_bytes = vp * w_item + 2 * 128 * 4 + 2 * d_lanes * 4
    avail = max(budget - 2 * table_bytes, 8 * per_row_bytes)
    n8 = _round_up(n, 8)
    cap = max(8, min(chunk_target, avail // per_row_bytes, n8))
    cap -= cap % 8
    chunk = cap
    for c in range(cap, max(cap // 2, 8) - 1, -8):   # prefer a divisor of n8
        if n8 % c == 0:
            chunk = c
            break
    n_pad = _round_up(n, chunk)
    n_chunks = n_pad // chunk

    # --- operands --------------------------------------------------------------
    # Clamp ids: PyTorch nn.Embedding would raise on out-of-range ids; here they
    # are remapped to the nearest valid row (documented semantic difference).
    ids = jnp.clip(rev.reshape(n).astype(jnp.int32), 0, V - 1)
    ids = jnp.pad(ids, (0, n_pad - n)).reshape(n_pad, 1)   # pad rows gather row 0
    w_padded = jnp.pad(weight.astype(w_dtype), ((0, vp - V), (0, 0)))

    # --- VMEM budget reflecting actual buffer counts ---------------------------
    vmem_limit = (
        2 * table_bytes                # resident table (x2 covers the fallback
                                       #   path that cannot single-buffer it)
        + 2 * chunk * 128 * 4          # ids block (chunk,1) i32, double-buffered
        + 2 * chunk * d_lanes * 4      # output tile, double-buffered
        + chunk * vp * w_item          # in-kernel one-hot intermediate
        + (2 << 20)                    # misc scratch headroom
    )
    vmem_limit = int(min(max(vmem_limit, 8 << 20), vmem_cap))

    def run(conservative):
        return pl.pallas_call(
            _onehot_gather_kernel,
            out_shape=jax.ShapeDtypeStruct((n_pad, D), jnp.float32),
            grid_spec=pltpu.PrefetchScalarGridSpec(
                num_scalar_prefetch=0,
                grid=(n_chunks,),
                in_specs=[
                    pl.BlockSpec((chunk, 1), lambda i: (i, 0)),          # ids
                    _table_block_spec(vp, D, single_buffer=not conservative),
                ],
                # Output width == D (full array dim) -> no wrapper column slice.
                # TODO(synk): a bf16 output would halve HBM writeback on v5e if
                # the downstream consumer tolerates it; kept f32 for exactness.
                out_specs=pl.BlockSpec((chunk, D), lambda i: (i, 0)),
            ),
            compiler_params=pltpu.CompilerParams(
                dimension_semantics=(("parallel",) if conservative
                                     else _chunk_axis_semantics()),
                vmem_limit_bytes=vmem_limit,
            ),
        )(ids, w_padded)

    try:
        gathered = run(conservative=False)
    except Exception:
        # Fall back to default double-buffering / "parallel" semantics if this
        # JAX/Mosaic build rejects Buffered(1) or CORE_PARALLEL.
        gathered = run(conservative=True)

    if n_pad != n:
        gathered = gathered[:n]            # drop pad rows (at most chunk - 1)
    rev_emb = gathered.reshape(B, L * D)   # contiguous (n, D) -> free reshape
    return rev_emb, lab


if __name__ == "__main__":
    # Small deterministic shapes consistent with the module
    # (module uses maxlen=128, embed_dim=100; maxlen scaled down for demo).
    B = 2      # batch
    L = 8      # sequence length (maxlen, scaled down)
    D = 100    # embed_dim (kept at the module's 100)
    V = 50     # vocab size

    key = jax.random.PRNGKey(0)
    k_w, k_ids, k_lab = jax.random.split(key, 3)

    # Deterministic "vocab.vectors" stand-in for the embedding weights.
    weight = jax.random.normal(k_w, (V, D), dtype=jnp.float32)
    rev = jax.random.randint(k_ids, (B, L), 0, V, dtype=jnp.int32)
    lab = jax.random.randint(k_lab, (B,), 0, 2, dtype=jnp.int32)

    rev_emb, lab_out = embedding_forward(rev, lab, weight)
    rev_emb = jax.block_until_ready(rev_emb)
    lab_out = jax.block_until_ready(lab_out)

    # Reference check (pure JAX gather + flatten).
    ref = jnp.take(weight, rev, axis=0).reshape(B, L * D)
    assert rev_emb.shape == (B, L * D)
    assert jnp.allclose(rev_emb, ref)
    assert jnp.array_equal(lab_out, lab)

    print("KERNEL_OK")
</pallas_src>

<mosaic_0001>
module attributes {stable_mosaic.version = 11 : i64} {
  func.func @_onehot_gather_kernel(%arg0: i32, %arg1: memref<16x1xi32, #tpu.memory_space<vmem>>, %arg2: memref<128x100xf32, #tpu.memory_space<vmem>>, %arg3: memref<16x100xf32, #tpu.memory_space<vmem>>) attributes {dimension_semantics = [#tpu.dimension_semantics<parallel>], iteration_bounds = array<i64: 1>, scalar_prefetch = 0 : i64, scratch_operands = 0 : i64, tpu.core_type = #tpu.core_type<tc>, window_params = [{transform_indices = @transform_0, window_bounds = array<i64: 16, 1>}, {pipeline_mode = #tpu.pipeline_mode<synchronous>, transform_indices = @transform_1, window_bounds = array<i64: 128, 100>}, {transform_indices = @transform_2, window_bounds = array<i64: 16, 100>}]} {
    %c0 = arith.constant 0 : index
    %c0_0 = arith.constant 0 : index
    %0 = vector.load %arg1[%c0, %c0_0] : memref<16x1xi32, #tpu.memory_space<vmem>>, vector<16x1xi32>
    %1 = tpu.iota {dimensions = array<i32: 1>} : vector<16x128xi32>
    %2 = vector.broadcast %0 : vector<16x1xi32> to vector<16x128xi32>
    %3 = arith.cmpi eq, %2, %1 : vector<16x128xi32>
    %4 = arith.extui %3 : vector<16x128xi1> to vector<16x128xi32>
    %5 = arith.sitofp %4 : vector<16x128xi32> to vector<16x128xf32>
    %c0_1 = arith.constant 0 : index
    %c0_2 = arith.constant 0 : index
    %6 = vector.load %arg2[%c0_1, %c0_2] : memref<128x100xf32, #tpu.memory_space<vmem>>, vector<128x100xf32>
    %cst = arith.constant dense<0.000000e+00> : vector<16x100xf32>
    %7 = tpu.matmul %5, %6, %cst {dimension_numbers = #tpu.dot_dimension_numbers<[1], [0], [0], [1], [0, 0, 1, 1], [], []>} : vector<16x128xf32>, vector<128x100xf32>, vector<16x100xf32> -> vector<16x100xf32>
    %c0_3 = arith.constant 0 : index
    %c0_4 = arith.constant 0 : index
    %8 = vector.load %arg3[%c0_3, %c0_4] : memref<16x100xf32, #tpu.memory_space<vmem>>, vector<16x100xf32>
    tpu.vector_store %arg3[%c0_3, %c0_4], %7 {strides = array<i32>} : memref<16x100xf32, #tpu.memory_space<vmem>>, vector<16x100xf32>,
    return
  }
  func.func @transform_0(%arg0: i32) -> (i32, i32) {
    %c0_i32 = arith.constant 0 : i32
    %c0_i32_0 = arith.constant 0 : i32
    return %arg0, %c0_i32 : i32, i32
  }
  func.func @transform_1(%arg0: i32) -> (i32, i32) {
    %c0_i32 = arith.constant 0 : i32
    %c0_i32_0 = arith.constant 0 : i32
    %c0_i32_1 = arith.constant 0 : i32
    return %c0_i32, %c0_i32_0 : i32, i32
  }
  func.func @transform_2(%arg0: i32) -> (i32, i32) {
    %c0_i32 = arith.constant 0 : i32
    %c0_i32_0 = arith.constant 0 : i32
    return %arg0, %c0_i32 : i32, i32
  }
}

module attributes {stable_mosaic.version = 11 : i64} {
  func.func @_onehot_gather_kernel(%arg0: i32, %arg1: memref<16x1xi32, #tpu.memory_space<vmem>>, %arg2: memref<128x100xf32, #tpu.memory_space<vmem>>, %arg3: memref<16x100xf32, #tpu.memory_space<vmem>>) attributes {dimension_semantics = [#tpu.dimension_semantics<parallel>], iteration_bounds = array<i64: 1>, scalar_prefetch = 0 : i64, scratch_operands = 0 : i64, tpu.core_type = #tpu.core_type<tc>, window_params = [{transform_indices = @transform_0, window_bounds = array<i64: 16, 1>}, {pipeline_mode = #tpu.pipeline_mode<synchronous>, transform_indices = @transform_1, window_bounds = array<i64: 128, 100>}, {transform_indices = @transform_2, window_bounds = array<i64: 16, 100>}]} {
    %c0 = arith.constant 0 : index
    %c0_0 = arith.constant 0 : index
    %0 = vector.load %arg1[%c0, %c0_0] : memref<16x1xi32, #tpu.memory_space<vmem>>, vector<16x1xi32>
    %1 = tpu.iota {dimensions = array<i32: 1>} : vector<16x128xi32>
    %2 = vector.broadcast %0 : vector<16x1xi32> to vector<16x128xi32>
    %3 = arith.cmpi eq, %2, %1 : vector<16x128xi32>
    %4 = arith.extui %3 : vector<16x128xi1> to vector<16x128xi32>
    %5 = arith.sitofp %4 : vector<16x128xi32> to vector<16x128xf32>
    %c0_1 = arith.constant 0 : index
    %c0_2 = arith.constant 0 : index
    %6 = vector.load %arg2[%c0_1, %c0_2] : memref<128x100xf32, #tpu.memory_space<vmem>>, vector<128x100xf32>
    %cst = arith.constant dense<0.000000e+00> : vector<16x100xf32>
    %7 = tpu.matmul %5, %6, %cst {dimension_numbers = #tpu.dot_dimension_numbers<[1], [0], [0], [1], [0, 0, 1, 1], [], []>} : vector<16x128xf32>, vector<128x100xf32>, vector<16x100xf32> -> vector<16x100xf32>
    %c0_3 = arith.constant 0 : index
    %c0_4 = arith.constant 0 : index
    %8 = vector.load %arg3[%c0_3, %c0_4] : memref<16x100xf32, #tpu.memory_space<vmem>>, vector<16x100xf32>
    tpu.vector_store %arg3[%c0_3, %c0_4], %7 {strides = array<i32>} : memref<16x100xf32, #tpu.memory_space<vmem>>, vector<16x100xf32>,
    return
  }
  func.func @transform_0(%arg0: i32) -> (i32, i32) {
    %c0_i32 = arith.constant 0 : i32
    %c0_i32_0 = arith.constant 0 : i32
    return %arg0, %c0_i32 : i32, i32
  }
  func.func @transform_1(%arg0: i32) -> (i32, i32) {
    %c0_i32 = arith.constant 0 : i32
    %c0_i32_0 = arith.constant 0 : i32
    %c0_i32_1 = arith.constant 0 : i32
    return %c0_i32, %c0_i32_0 : i32, i32
  }
  func.func @transform_2(%arg0: i32) -> (i32, i32) {
    %c0_i32 = arith.constant 0 : i32
    %c0_i32_0 = arith.constant 0 : i32
    return %arg0, %c0_i32 : i32, i32
  }
}

</mosaic_0001>

<bundles_post_ra>
// kernel: tpu_custom_call.1
= control target key start
LH: loop header
LB: loop body
LE: loop exit
PB: predicated region body
PF: predicated region fallthrough
CT: control target
= control target key end

     0   :  { %v140_v2 = vmov 0   ;;  %s217_s0 = inlined_call_operand.vmem [shape: s32[16,1], index: 0, kind: input, shape index: {}]   ;;  %s218_s1 = inlined_call_operand.vmem [shape: f32[128,100], index: 1, kind: input, shape index: {}]   ;;  %s219_s2 = inlined_call_operand.hbm [shape: f32[16,100], index: 2, kind: output, shape index: {}]  }
   0x1   :  { %v12_v0 = vld [vmem:[%s217_s0] sm:$0xff]  ;;  %v43_v1 = vld [vmem:[%s218_s1 + $0x78] sm:$0xff]  ;;  %113 = vset.pattern.permute.xlu0 %v140_v2  ;;  %v42_v3 = vld [vmem:[%s218_s1 + $0x70] sm:$0xff] }
   0x2   :  { %44 = vmatpush.msra.mxu0 %v43_v1  ;;  %17 = vperm.xlu0 %113, %v12_v0   ;;  %v41_v4 = vld [vmem:[%s218_s1 + $0x68] sm:$0xff]  ;;  %v40_v5 = vld [vmem:[%s218_s1 + $0x60] sm:$0xff] }
   0x3   :  { %92 = vmatpush.msra.mxu1 %v43_v1 }
   0x4   :  { %45 = vmatpush.msra.mxu0 %v42_v3 }
   0x5   :  { %93 = vmatpush.msra.mxu1 %v42_v3 }
   0x6   :  { %46 = vmatpush.msra.mxu0 %v41_v4 }
   0x7   :  { %7 = vsyncpa [#allocation3], 0  ;;  %v39_v6 = vld [vmem:[%s218_s1 + $0x58] sm:$0xff]  ;;  %94 = vmatpush.msra.mxu1 %v41_v4  ;;  %v13_v7 = vld [vmem:[%s217_s0 + $0x8] sm:$0xff]  ;;  %v14_v19 = vlaneseq  ;;  %v141_v22 = vmov 1.0   ;;  %vm67_vm2 = vcmask 818176  }
   0x8   :  { %47 = vmatpush.msra.mxu0 %v40_v5  ;;  %v38_v8 = vld [vmem:[%s218_s1 + $0x50] sm:$0xff]  ;;  %v37_v9 = vld [vmem:[%s218_s1 + $0x48] sm:$0xff]  ;;  %v36_v10 = vld [vmem:[%s218_s1 + $0x40] sm:$0xff]  ;;  %s142_s16 = smov [#allocation2]   ;;  %s143_s20 = smov 128  }
   0x9   :  { %95 = vmatpush.msra.mxu1 %v40_v5  ;;  %v35_v11 = vld [vmem:[%s218_s1 + $0x38] sm:$0xff]  ;;  %v34_v12 = vld [vmem:[%s218_s1 + $0x30] sm:$0xff]  ;;  %v33_v13 = vld [vmem:[%s218_s1 + $0x28] sm:$0xff]  ;;  %v15_v20 = vand.u32 127, %v14_v19  ;;  %s74_s17 = sshll.u32 %s142_s16, 4  ;;  %s144_s21 = smov 8   ;;  %s75_s17 = int_to_ptr.vmem [resolvable:$true] %s74_s17 }
   0xa   :  { %48 = vmatpush.msra.mxu0 %v39_v6  ;;  %20 = vperm.xlu0 %113, %v13_v7   ;;  %v32_v14 = vld [vmem:[%s218_s1 + $0x20] sm:$0xff]  ;;  %v31_v15 = vld [vmem:[%s218_s1 + $0x18] sm:$0xff]  ;;  %v30_v16 = vld [vmem:[%s218_s1 + $0x10] sm:$0xff] }
   0xb   :  { %96 = vmatpush.msra.mxu1 %v39_v6  ;;  %v29_v17 = vld [vmem:[%s218_s1 + $0x8] sm:$0xff]  ;;  %v28_v18 = vld [vmem:[%s218_s1] sm:$0xff]  ;;  %s76_s1 = sshll.u32 %s219_s2, 4  ;;  %s77_s1 = int_to_ptr.hbm [resolvable:$true] %s76_s1 }
   0xc   :  { %49 = vmatpush.msra.mxu0 %v38_v8 }
   0xd   :  { %97 = vmatpush.msra.mxu1 %v38_v8 }
   0xe   :  { %50 = vmatpush.msra.mxu0 %v37_v9 }
   0xf   :  { %98 = vmatpush.msra.mxu1 %v37_v9 }
  0x10   :  { %51 = vmatpush.msra.mxu0 %v36_v10 }
  0x11   :  { %99 = vmatpush.msra.mxu1 %v36_v10 }
  0x12   :  { %52 = vmatpush.msra.mxu0 %v35_v11 }
  0x13   :  { %100 = vmatpush.msra.mxu1 %v35_v11 }
  0x14   :  { %53 = vmatpush.msra.mxu0 %v34_v12 }
  0x15   :  { %101 = vmatpush.msra.mxu1 %v34_v12 }
  0x16   :  { %54 = vmatpush.msra.mxu0 %v33_v13 }
  0x17   :  { %102 = vmatpush.msra.mxu1 %v33_v13 }
  0x18   :  { %55 = vmatpush.msra.mxu0 %v32_v14 }
  0x19   :  { %103 = vmatpush.msra.mxu1 %v32_v14 }
  0x1a   :  { %56 = vmatpush.msra.mxu0 %v31_v15 }
  0x1b   :  { %104 = vmatpush.msra.mxu1 %v31_v15 }
  0x1c   :  { %57 = vmatpush.msra.mxu0 %v30_v16 }
  0x1d   :  { %105 = vmatpush.msra.mxu1 %v30_v16 }
  0x1e   :  { %58 = vmatpush.msra.mxu0 %v29_v17 }
  0x1f   :  { %106 = vmatpush.msra.mxu1 %v29_v17 }
  0x20   :  { %59 = vmatpush.msra.mxu0 %v28_v18 }
  0x21   :  { %107 = vmatpush.msra.mxu1 %v28_v18 }
  0x74   :  { %v18_v21 = vpop.permute.xlu0 %17 }
  0x75   :  { %vm22_vm0 = vcmp.eq.s32.totalorder %v18_v21, %v15_v20 }
  0x76   :  { %90 = vmatmul.msk.f32.vlgmr.msra.gmra.mxu0 %vm22_vm0, %v141_v22 }
  0x7c   :  { %v21_v23 = vpop.permute.xlu0 %20 }
  0x7d   :  { %vm23_vm1 = vcmp.eq.s32.totalorder %v21_v23, %v15_v20 }
  0x7e   :  { %91 = vmatmul.msk.f32.vlgmr.msra.gmra.mxu1 %vm23_vm1, %v141_v22 }
  0xf3   :  { %v61_v24 = vpop.f32.mrf.mxu0 }
  0xf4   :  { %68 = vst.msk [vmem:[#allocation2] sm:$0xff] %vm67_vm2, %v61_v24 }
  0xfb   :  { %v64_v25 = vpop.f32.mrf.mxu1 }
  0xfc   :  { %69 = vst.msk [vmem:[#allocation2 + $0x8] sm:$0xff] %vm67_vm2, %v64_v25 }
  0xfd   :  { %82 = dma.vmem_to_hbm [thread:$0]  %s75_s17, 256, %s77_s1, [#allocation3], %s143_s20, %s143_s20, %s144_s21  }
  0xfe   :  { %138 = dma.done.wait [#allocation3], 256  }
  0xff   :  { %139 = vsyncadd [#allocation3], 4294967040 }
 0x100   :  { %87 = vsyncpa [#allocation3], 1 }

// kernel: tpu_custom_call.1
= control target key start
LH: loop header
LB: loop body
LE: loop exit
PB: predicated region body
PF: predicated region fallthrough
CT: control target
= control target key end

     0   :  { %v140_v2 = vmov 0   ;;  %s217_s0 = inlined_call_operand.vmem [shape: s32[16,1], index: 0, kind: input, shape index: {}]   ;;  %s218_s1 = inlined_call_operand.vmem [shape: f32[128,100], index: 1, kind: input, shape index: {}]   ;;  %s219_s2 = inlined_call_operand.hbm [shape: f32[16,100], index: 2, kind: output, shape index: {}]  }
   0x1   :  { %v12_v0 = vld [vmem:[%s217_s0] sm:$0xff]  ;;  %v43_v1 = vld [vmem:[%s218_s1 + $0x78] sm:$0xff]  ;;  %113 = vset.pattern.permute.xlu0 %v140_v2  ;;  %v42_v3 = vld [vmem:[%s218_s1 + $0x70] sm:$0xff] }
   0x2   :  { %44 = vmatpush.msra.mxu0 %v43_v1  ;;  %17 = vperm.xlu0 %113, %v12_v0   ;;  %v41_v4 = vld [vmem:[%s218_s1 + $0x68] sm:$0xff]  ;;  %v40_v5 = vld [vmem:[%s218_s1 + $0x60] sm:$0xff] }
   0x3   :  { %92 = vmatpush.msra.mxu1 %v43_v1 }
   0x4   :  { %45 = vmatpush.msra.mxu0 %v42_v3 }
   0x5   :  { %93 = vmatpush.msra.mxu1 %v42_v3 }
   0x6   :  { %46 = vmatpush.msra.mxu0 %v41_v4 }
   0x7   :  { %7 = vsyncpa [#allocation3], 0  ;;  %v39_v6 = vld [vmem:[%s218_s1 + $0x58] sm:$0xff]  ;;  %94 = vmatpush.msra.mxu1 %v41_v4  ;;  %v13_v7 = vld [vmem:[%s217_s0 + $0x8] sm:$0xff]  ;;  %v14_v19 = vlaneseq  ;;  %v141_v22 = vmov 1.0   ;;  %vm67_vm2 = vcmask 818176  }
   0x8   :  { %47 = vmatpush.msra.mxu0 %v40_v5  ;;  %v38_v8 = vld [vmem:[%s218_s1 + $0x50] sm:$0xff]  ;;  %v37_v9 = vld [vmem:[%s218_s1 + $0x48] sm:$0xff]  ;;  %v36_v10 = vld [vmem:[%s218_s1 + $0x40] sm:$0xff]  ;;  %s142_s16 = smov [#allocation2]   ;;  %s143_s20 = smov 128  }
   0x9   :  { %95 = vmatpush.msra.mxu1 %v40_v5  ;;  %v35_v11 = vld [vmem:[%s218_s1 + $0x38] sm:$0xff]  ;;  %v34_v12 = vld [vmem:[%s218_s1 + $0x30] sm:$0xff]  ;;  %v33_v13 = vld [vmem:[%s218_s1 + $0x28] sm:$0xff]  ;;  %v15_v20 = vand.u32 127, %v14_v19  ;;  %s74_s17 = sshll.u32 %s142_s16, 4  ;;  %s144_s21 = smov 8   ;;  %s75_s17 = int_to_ptr.vmem [resolvable:$true] %s74_s17 }
   0xa   :  { %48 = vmatpush.msra.mxu0 %v39_v6  ;;  %20 = vperm.xlu0 %113, %v13_v7   ;;  %v32_v14 = vld [vmem:[%s218_s1 + $0x20] sm:$0xff]  ;;  %v31_v15 = vld [vmem:[%s218_s1 + $0x18] sm:$0xff]  ;;  %v30_v16 = vld [vmem:[%s218_s1 + $0x10] sm:$0xff] }
   0xb   :  { %96 = vmatpush.msra.mxu1 %v39_v6  ;;  %v29_v17 = vld [vmem:[%s218_s1 + $0x8] sm:$0xff]  ;;  %v28_v18 = vld [vmem:[%s218_s1] sm:$0xff]  ;;  %s76_s1 = sshll.u32 %s219_s2, 4  ;;  %s77_s1 = int_to_ptr.hbm [resolvable:$true] %s76_s1 }
   0xc   :  { %49 = vmatpush.msra.mxu0 %v38_v8 }
   0xd   :  { %97 = vmatpush.msra.mxu1 %v38_v8 }
   0xe   :  { %50 = vmatpush.msra.mxu0 %v37_v9 }
   0xf   :  { %98 = vmatpush.msra.mxu1 %v37_v9 }
  0x10   :  { %51 = vmatpush.msra.mxu0 %v36_v10 }
  0x11   :  { %99 = vmatpush.msra.mxu1 %v36_v10 }
  0x12   :  { %52 = vmatpush.msra.mxu0 %v35_v11 }
  0x13   :  { %100 = vmatpush.msra.mxu1 %v35_v11 }
  0x14   :  { %53 = vmatpush.msra.mxu0 %v34_v12 }
  0x15   :  { %101 = vmatpush.msra.mxu1 %v34_v12 }
  0x16   :  { %54 = vmatpush.msra.mxu0 %v33_v13 }
  0x17   :  { %102 = vmatpush.msra.mxu1 %v33_v13 }
  0x18   :  { %55 = vmatpush.msra.mxu0 %v32_v14 }
  0x19   :  { %103 = vmatpush.msra.mxu1 %v32_v14 }
  0x1a   :  { %56 = vmatpush.msra.mxu0 %v31_v15 }
  0x1b   :  { %104 = vmatpush.msra.mxu1 %v31_v15 }
  0x1c   :  { %57 = vmatpush.msra.mxu0 %v30_v16 }
  0x1d   :  { %105 = vmatpush.msra.mxu1 %v30_v16 }
  0x1e   :  { %58 = vmatpush.msra.mxu0 %v29_v17 }
  0x1f   :  { %106 = vmatpush.msra.mxu1 %v29_v17 }
  0x20   :  { %59 = vmatpush.msra.mxu0 %v28_v18 }
  0x21   :  { %107 = vmatpush.msra.mxu1 %v28_v18 }
  0x74   :  { %v18_v21 = vpop.permute.xlu0 %17 }
  0x75   :  { %vm22_vm0 = vcmp.eq.s32.totalorder %v18_v21, %v15_v20 }
  0x76   :  { %90 = vmatmul.msk.f32.vlgmr.msra.gmra.mxu0 %vm22_vm0, %v141_v22 }
  0x7c   :  { %v21_v23 = vpop.permute.xlu0 %20 }
  0x7d   :  { %vm23_vm1 = vcmp.eq.s32.totalorder %v21_v23, %v15_v20 }
  0x7e   :  { %91 = vmatmul.msk.f32.vlgmr.msra.gmra.mxu1 %vm23_vm1, %v141_v22 }
  0xf3   :  { %v61_v24 = vpop.f32.mrf.mxu0 }
  0xf4   :  { %68 = vst.msk [vmem:[#allocation2] sm:$0xff] %vm67_vm2, %v61_v24 }
  0xfb   :  { %v64_v25 = vpop.f32.mrf.mxu1 }
  0xfc   :  { %69 = vst.msk [vmem:[#allocation2 + $0x8] sm:$0xff] %vm67_vm2, %v64_v25 }
  0xfd   :  { %82 = dma.vmem_to_hbm [thread:$0]  %s75_s17, 256, %s77_s1, [#allocation3], %s143_s20, %s143_s20, %s144_s21  }
  0xfe   :  { %138 = dma.done.wait [#allocation3], 256  }
  0xff   :  { %139 = vsyncadd [#allocation3], 4294967040 }
 0x100   :  { %87 = vsyncpa [#allocation3], 1 }

</bundles_post_ra>
